<compile_context>
chip_gen: v7x
topology: tpu7x:2x2x1
jax: 0.10.0
libtpu: 0.0.40
codegen_flags: <defaults>
</compile_context>

<pallas_src>
import functools

import jax
import jax.numpy as jnp
from jax.experimental import pallas as pl
from jax.experimental.pallas import tpu as pltpu

try:
    _CompilerParams = pltpu.CompilerParams
except AttributeError:  # very old JAX releases
    _CompilerParams = pltpu.TPUCompilerParams  # pragma: no cover


def _round_up(x, m):
    return ((x + m - 1) // m) * m


def _parallel_params():
    return _CompilerParams(dimension_semantics=("parallel",))


# --------------------------------------------------------------------------
# Pallas kernels
# --------------------------------------------------------------------------

def _fused_ir_kernel(*refs, W, Chid, OFF, pad_rows, has_expand, use_res):
    """Fused inverted-residual block (stride 1):
       1x1 expand (+BN, ReLU6) -> depthwise 3x3 (+BN, ReLU6) -> 1x1 project (+BN)
       -> optional residual add.  One batch item per grid step, everything in VMEM."""
    if has_expand:
        (x_ref, ew_ref, eb_ref, dw_ref, db_ref, pw_ref, pb_ref,
         lmask_ref, rmask_ref, o_ref, pad_ref) = refs
    else:
        (x_ref, dw_ref, db_ref, pw_ref, pb_ref,
         lmask_ref, rmask_ref, o_ref, pad_ref) = refs

    HW = x_ref.shape[1]
    x = x_ref[0]                                              # (HW, Cin) bf16

    # ---- 1x1 expand on the MXU, f32 accumulation ----
    if has_expand:
        h = jnp.dot(x, ew_ref[...], preferred_element_type=jnp.float32)
        h = jnp.clip(h + eb_ref[...], 0.0, 6.0)               # (HW, Chid) f32
        h_store = h.astype(jnp.bfloat16)
    else:
        h_store = x                                           # (HW, Chid) bf16

    # ---- depthwise 3x3, stride 1, pad 1, in flattened (row-major) space ----
    # Scratch rows [OFF, OFF+HW) hold the activation (written every step); only the
    # top/bottom halo rows must be re-zeroed (they are read, never written by taps).
    # Left/right column padding is handled with precomputed 0/1 masks.
    bot = pad_rows - OFF - HW
    pad_ref[pl.ds(0, OFF), :] = jnp.zeros((OFF, Chid), jnp.bfloat16)
    pad_ref[pl.ds(OFF + HW, bot), :] = jnp.zeros((bot, Chid), jnp.bfloat16)
    pad_ref[pl.ds(OFF, HW), :] = h_store

    lm = lmask_ref[...]                                       # (HW, 1) f32
    rm = rmask_ref[...]                                       # (HW, 1) f32
    acc = None
    for kh in range(3):
        for kw in range(3):
            start = OFF + (kh - 1) * W + (kw - 1)             # static, >= 7
            if kh == 1 and kw == 1:
                t = h_store.astype(jnp.float32)               # centre tap: reuse regs
            else:
                t = pad_ref[pl.ds(start, HW), :].astype(jnp.float32)
            if kw == 0:
                t = t * lm
            elif kw == 2:
                t = t * rm
            term = t * dw_ref[pl.ds(3 * kh + kw, 1), :]       # per-channel tap weight
            acc = term if acc is None else acc + term
    acc = jnp.clip(acc + db_ref[...], 0.0, 6.0)               # (HW, Chid) f32

    # ---- 1x1 linear projection on the MXU + optional residual ----
    y = jnp.dot(acc.astype(jnp.bfloat16), pw_ref[...],
                preferred_element_type=jnp.float32)
    y = y + pb_ref[...]
    if use_res:
        y = y + x.astype(jnp.float32)
    o_ref[0] = y.astype(o_ref.dtype)


def _mm_bias_kernel(x_ref, w_ref, b_ref, o_ref, *, relu6):
    """out = act(x @ w + b); bf16 operands, f32 accumulation on the MXU."""
    y = jnp.dot(x_ref[...], w_ref[...], preferred_element_type=jnp.float32)
    y = y + b_ref[...]
    if relu6:
        y = jnp.clip(y, 0.0, 6.0)
    o_ref[...] = y.astype(o_ref.dtype)


def _dw_proj_kernel(p_ref, dw_ref, db_ref, pw_ref, pb_ref, o_ref):
    """Depthwise 3x3 on tap-major patches (9, R, C): 9 unrolled VPU FMAs, then ReLU6,
       then the 1x1 projection matmul -- all fused (used for the 4 stride-2 blocks)."""
    acc = None
    for k in range(9):
        t = p_ref[k].astype(jnp.float32)                      # (TR, Chid), lane-dense
        term = t * dw_ref[pl.ds(k, 1), :]
        acc = term if acc is None else acc + term
    acc = jnp.clip(acc + db_ref[...], 0.0, 6.0)
    y = jnp.dot(acc.astype(jnp.bfloat16), pw_ref[...],
                preferred_element_type=jnp.float32) + pb_ref[...]
    o_ref[...] = y.astype(o_ref.dtype)


def _head_pool_cls_kernel(x_ref, hw_ref, hb_ref, p_ref, cw_ref, cb_ref, o_ref):
    """Head 1x1 conv (320->1280, ReLU6) + global average pool (as a matmul with a
       pooling matrix) + classifier Linear(1280, num_classes), fused."""
    y = jnp.dot(x_ref[...], hw_ref[...], preferred_element_type=jnp.float32)
    y = jnp.clip(y + hb_ref[...], 0.0, 6.0)                   # (R, 1280) f32
    pooled = jnp.dot(p_ref[...], y, preferred_element_type=jnp.float32)   # (N, 1280)
    logits = jnp.dot(pooled.astype(jnp.bfloat16), cw_ref[...],
                     preferred_element_type=jnp.float32) + cb_ref[...]
    o_ref[...] = logits


# --------------------------------------------------------------------------
# Pallas wrappers
# --------------------------------------------------------------------------

def fused_inverted_residual(x, H, W, blk):
    """x: (N, H*W, Cin) bf16 -> (N, H*W, Cout) bf16 (stride-1 blocks only)."""
    N, HW, Cin = x.shape
    Cout = blk["cout"]
    has_expand = blk["expand_w"] is not None
    Chid = blk["dw_w"].shape[1]
    use_res = (Cin == Cout)
    OFF = _round_up(W + 8, 16)           # 16-aligned start (bf16 sublane packing)
    pad_rows = OFF + HW + W + 8

    # 0/1 column-edge masks (left neighbour invalid at j==0, right at j==W-1)
    cols = jnp.arange(HW, dtype=jnp.int32) % W
    lmask = (cols != 0).astype(jnp.float32).reshape(HW, 1)
    rmask = (cols != (W - 1)).astype(jnp.float32).reshape(HW, 1)

    args = [x]
    in_specs = [pl.BlockSpec((1, HW, Cin), lambda n: (n, 0, 0))]
    if has_expand:
        args += [blk["expand_w"], blk["expand_b"]]
        in_specs += [pl.BlockSpec((Cin, Chid), lambda n: (0, 0)),
                     pl.BlockSpec((1, Chid), lambda n: (0, 0))]
    args += [blk["dw_w"], blk["dw_b"], blk["proj_w"], blk["proj_b"], lmask, rmask]
    in_specs += [pl.BlockSpec((9, Chid), lambda n: (0, 0)),
                 pl.BlockSpec((1, Chid), lambda n: (0, 0)),
                 pl.BlockSpec((Chid, Cout), lambda n: (0, 0)),
                 pl.BlockSpec((1, Cout), lambda n: (0, 0)),
                 pl.BlockSpec((HW, 1), lambda n: (0, 0)),
                 pl.BlockSpec((HW, 1), lambda n: (0, 0))]

    kern = functools.partial(_fused_ir_kernel, W=W, Chid=Chid, OFF=OFF,
                             pad_rows=pad_rows, has_expand=has_expand,
                             use_res=use_res)
    return pl.pallas_call(
        kern,
        out_shape=jax.ShapeDtypeStruct((N, HW, Cout), jnp.bfloat16),
        grid=(N,),
        in_specs=in_specs,
        out_specs=pl.BlockSpec((1, HW, Cout), lambda n: (n, 0, 0)),
        scratch_shapes=[pltpu.VMEM((pad_rows, Chid), jnp.bfloat16)],
        compiler_params=_parallel_params(),
    )(*args)


def matmul_bias(x, w, b, *, relu6, out_dtype=jnp.bfloat16, row_tile=512):
    """x: (R, K) bf16, w: (K, N) bf16, b: (1, N) f32 -> (R, N)."""
    R, K = x.shape
    Nc = w.shape[1]
    TR = R if R <= row_tile else row_tile
    grid = (pl.cdiv(R, TR),)
    return pl.pallas_call(
        functools.partial(_mm_bias_kernel, relu6=relu6),
        out_shape=jax.ShapeDtypeStruct((R, Nc), out_dtype),
        grid=grid,
        in_specs=[pl.BlockSpec((TR, K), lambda i: (i, 0)),
                  pl.BlockSpec((K, Nc), lambda i: (0, 0)),
                  pl.BlockSpec((1, Nc), lambda i: (0, 0))],
        out_specs=pl.BlockSpec((TR, Nc), lambda i: (i, 0)),
        compiler_params=_parallel_params(),
    )(x, w, b)


def dw_project(patches, dw_w, dw_b, proj_w, proj_b, *, row_tile=512):
    """patches: (9, R, Chid) bf16 -> fused depthwise+ReLU6+project output (R, Cout) bf16."""
    _, R, Chid = patches.shape
    Cout = proj_w.shape[1]
    TR = R if R <= row_tile else row_tile
    grid = (pl.cdiv(R, TR),)
    return pl.pallas_call(
        _dw_proj_kernel,
        out_shape=jax.ShapeDtypeStruct((R, Cout), jnp.bfloat16),
        grid=grid,
        in_specs=[pl.BlockSpec((9, TR, Chid), lambda i: (0, i, 0)),
                  pl.BlockSpec((9, Chid), lambda i: (0, 0)),
                  pl.BlockSpec((1, Chid), lambda i: (0, 0)),
                  pl.BlockSpec((Chid, Cout), lambda i: (0, 0)),
                  pl.BlockSpec((1, Cout), lambda i: (0, 0))],
        out_specs=pl.BlockSpec((TR, Cout), lambda i: (i, 0)),
        compiler_params=_parallel_params(),
    )(patches, dw_w, dw_b, proj_w, proj_b)


def head_pool_classifier(x2, head_w, head_b, pool_mat, cls_w, cls_b):
    """x2: (N*HW, 320) bf16, pool_mat: (N, N*HW) f32 -> logits (N, num_classes) f32."""
    N = pool_mat.shape[0]
    nc = cls_w.shape[1]
    return pl.pallas_call(
        _head_pool_cls_kernel,
        out_shape=jax.ShapeDtypeStruct((N, nc), jnp.float32),
    )(x2, head_w, head_b, pool_mat, cls_w, cls_b)


# --------------------------------------------------------------------------
# JAX glue: im2col (only used for the stem and the 4 stride-2 blocks, at output
# resolution, tap-major layout so each tap is a lane-dense (R, C) slab)
# --------------------------------------------------------------------------

def extract_3x3_patches(x, stride):
    """x: (N, H, W, C), pad=1 -> patches (9, N*Ho*Wo, C) and (Ho, Wo)."""
    N, H, W, C = x.shape
    Ho = (H - 1) // stride + 1
    Wo = (W - 1) // stride + 1
    xp = jnp.pad(x, ((0, 0), (1, 1), (1, 1), (0, 0)))
    taps = []
    for kh in range(3):
        for kw in range(3):
            t = xp[:, kh:kh + (Ho - 1) * stride + 1:stride,
                      kw:kw + (Wo - 1) * stride + 1:stride, :]
            taps.append(t.reshape(N * Ho * Wo, C))
    return jnp.stack(taps, axis=0), (Ho, Wo)


def strided_inverted_residual(x, H, W, blk):
    """Stride-2 inverted-residual block.  x: (N, H*W, Cin) bf16 -> (N, Ho*Wo, Cout)."""
    N, HW, Cin = x.shape
    has_expand = blk["expand_w"] is not None
    Chid = blk["dw_w"].shape[1]
    Cout = blk["cout"]
    if has_expand:
        h = matmul_bias(x.reshape(N * HW, Cin), blk["expand_w"], blk["expand_b"],
                        relu6=True)
    else:
        h = x.reshape(N * HW, Cin)
    patches, (Ho, Wo) = extract_3x3_patches(h.reshape(N, H, W, Chid), stride=2)
    y = dw_project(patches, blk["dw_w"], blk["dw_b"], blk["proj_w"], blk["proj_b"])
    return y.reshape(N, Ho * Wo, Cout), Ho, Wo


# --------------------------------------------------------------------------
# Parameter construction (deterministic, BN folded into conv weight/bias)
# --------------------------------------------------------------------------

_MBV2_CFG = [
    # t, c, n, s  (torchvision mobilenet_v2, width_mult=1.0)
    (1, 16, 1, 1),
    (6, 24, 2, 2),
    (6, 32, 3, 2),
    (6, 64, 4, 2),
    (6, 96, 3, 1),
    (6, 160, 3, 2),
    (6, 320, 1, 1),
]


def make_params(key, num_classes):
    keys = iter(jax.random.split(key, 512))

    def nk():
        return next(keys)

    def bn_fold(c, eps=1e-5):
        gamma = 1.0 + 0.1 * jax.random.normal(nk(), (c,))
        beta = 0.05 * jax.random.normal(nk(), (c,))
        mean = 0.05 * jax.random.normal(nk(), (c,))
        var = jax.random.uniform(nk(), (c,), minval=0.5, maxval=1.5)
        scale = gamma / jnp.sqrt(var + eps)
        bias = beta - mean * scale
        return scale.astype(jnp.float32), bias.astype(jnp.float32)

    params = {}

    # Stem: Conv2d(3, 32, k=3, s=2, p=1, bias=False) + BN + ReLU6
    w = 0.1 * jax.random.normal(nk(), (3, 3, 3, 32))       # (kh, kw, Cin, Cout)
    s, b = bn_fold(32)
    params["stem_w"] = (w * s).reshape(27, 32).astype(jnp.bfloat16)
    params["stem_b"] = b.reshape(1, 32)

    # Inverted residual blocks
    blocks = []
    cin = 32
    for t, c, n, s0 in _MBV2_CFG:
        for i in range(n):
            stride = s0 if i == 0 else 1
            hid = cin * t
            blk = {"stride": stride, "cout": c}
            if t != 1:
                w = 0.1 * jax.random.normal(nk(), (cin, hid))       # 1x1 expand
                sc, bb = bn_fold(hid)
                blk["expand_w"] = (w * sc).astype(jnp.bfloat16)
                blk["expand_b"] = bb.reshape(1, hid)
            else:
                blk["expand_w"] = None
                blk["expand_b"] = None
            w = 0.1 * jax.random.normal(nk(), (3, 3, hid))          # depthwise 3x3
            sc, bb = bn_fold(hid)
            blk["dw_w"] = (w.reshape(9, hid) * sc).astype(jnp.float32)
            blk["dw_b"] = bb.reshape(1, hid)
            w = 0.1 * jax.random.normal(nk(), (hid, c))             # 1x1 project (linear)
            sc, bb = bn_fold(c)
            blk["proj_w"] = (w * sc).astype(jnp.bfloat16)
            blk["proj_b"] = bb.reshape(1, c)
            blocks.append(blk)
            cin = c
    params["blocks"] = blocks

    # Head: Conv2d(320, 1280, k=1, bias=False) + BN + ReLU6
    w = 0.1 * jax.random.normal(nk(), (320, 1280))
    sc, bb = bn_fold(1280)
    params["head_w"] = (w * sc).astype(jnp.bfloat16)
    params["head_b"] = bb.reshape(1, 1280)

    # Classifier: Dropout(0.2) [identity in eval], Linear(1280, num_classes)
    params["cls_w"] = (0.05 * jax.random.normal(nk(), (1280, num_classes))).astype(jnp.bfloat16)
    params["cls_b"] = (0.01 * jax.random.normal(nk(), (num_classes,))
                       ).astype(jnp.float32).reshape(1, num_classes)
    return params


# --------------------------------------------------------------------------
# Forward pass (StudentModel.forward == MobileNetV2.forward, eval mode)
# --------------------------------------------------------------------------

def student_model_forward(x_nchw, params):
    """x_nchw: (N, 3, H, W) float32 -> logits (N, num_classes) float32."""
    x = jnp.transpose(x_nchw, (0, 2, 3, 1)).astype(jnp.bfloat16)   # -> NHWC, bf16
    N = x.shape[0]

    # Stem conv 3x3 / s2 via (tiny, 27-wide) im2col + MXU matmul + ReLU6
    patches, (H, W) = extract_3x3_patches(x, stride=2)             # (9, R, 3)
    p2 = jnp.transpose(patches, (1, 0, 2)).reshape(N * H * W, 27)
    y = matmul_bias(p2, params["stem_w"], params["stem_b"], relu6=True)
    x = y.reshape(N, H * W, 32)

    # Inverted residual blocks: fully fused kernel for stride-1 blocks,
    # expand + fused dw/project for the 4 stride-2 blocks.
    for blk in params["blocks"]:
        if blk["stride"] == 1:
            x = fused_inverted_residual(x, H, W, blk)
        else:
            x, H, W = strided_inverted_residual(x, H, W, blk)

    # Head 1x1 conv (320->1280, ReLU6) + global average pool + classifier, fused.
    Nb, HW, C = x.shape
    pool_mat = jnp.repeat(jnp.eye(Nb, dtype=jnp.float32), HW, axis=1) / float(HW)
    logits = head_pool_classifier(x.reshape(Nb * HW, C), params["head_w"],
                                  params["head_b"], pool_mat,
                                  params["cls_w"], params["cls_b"])
    return logits


# --------------------------------------------------------------------------

if __name__ == "__main__":
    num_classes = 10
    key = jax.random.PRNGKey(0)
    kp, kx = jax.random.split(key)

    params = make_params(kp, num_classes=num_classes)
    x = jax.random.normal(kx, (2, 3, 32, 32), dtype=jnp.float32)   # NCHW like PyTorch

    logits = student_model_forward(x, params)
    logits = jax.block_until_ready(logits)

    assert logits.shape == (2, num_classes), logits.shape
    assert bool(jnp.all(jnp.isfinite(logits)))
    print("KERNEL_OK")
</pallas_src>

<mosaic_0001>
module attributes {stable_mosaic.version = 11 : i64} {
  func.func @_mm_bias_kernel(%arg0: i32, %arg1: memref<512x27xbf16, #tpu.memory_space<vmem>>, %arg2: memref<27x32xbf16, #tpu.memory_space<vmem>>, %arg3: memref<1x32xf32, #tpu.memory_space<vmem>>, %arg4: memref<512x32xbf16, #tpu.memory_space<vmem>>) attributes {dimension_semantics = [#tpu.dimension_semantics<parallel>], iteration_bounds = array<i64: 1>, scalar_prefetch = 0 : i64, scratch_operands = 0 : i64, tpu.core_type = #tpu.core_type<tc>, window_params = [{transform_indices = @transform_0, window_bounds = array<i64: 512, 27>}, {pipeline_mode = #tpu.pipeline_mode<synchronous>, transform_indices = @transform_1, window_bounds = array<i64: 27, 32>}, {pipeline_mode = #tpu.pipeline_mode<synchronous>, transform_indices = @transform_2, window_bounds = array<i64: 1, 32>}, {transform_indices = @transform_3, window_bounds = array<i64: 512, 32>}]} {
    %c0 = arith.constant 0 : index
    %c0_0 = arith.constant 0 : index
    %0 = vector.load %arg1[%c0, %c0_0] : memref<512x27xbf16, #tpu.memory_space<vmem>>, vector<512x27xbf16>
    %c0_1 = arith.constant 0 : index
    %c0_2 = arith.constant 0 : index
    %1 = vector.load %arg2[%c0_1, %c0_2] : memref<27x32xbf16, #tpu.memory_space<vmem>>, vector<27x32xbf16>
    %cst = arith.constant dense<0.000000e+00> : vector<512x32xf32>
    %2 = tpu.matmul %0, %1, %cst {dimension_numbers = #tpu.dot_dimension_numbers<[1], [0], [0], [1], [0, 0, 1, 1], [], []>} : vector<512x27xbf16>, vector<27x32xbf16>, vector<512x32xf32> -> vector<512x32xf32>
    %c0_3 = arith.constant 0 : index
    %c0_4 = arith.constant 0 : index
    %3 = vector.load %arg3[%c0_3, %c0_4] : memref<1x32xf32, #tpu.memory_space<vmem>>, vector<1x32xf32>
    %4 = vector.broadcast %3 : vector<1x32xf32> to vector<512x32xf32>
    %5 = arith.addf %2, %4 : vector<512x32xf32>
    %cst_5 = arith.constant 0.000000e+00 : f32
    %cst_6 = arith.constant 6.000000e+00 : f32
    %6 = vector.broadcast %cst_5 : f32 to vector<512x32xf32>
    %7 = arith.maximumf %6, %5 : vector<512x32xf32>
    %8 = vector.broadcast %cst_6 : f32 to vector<512x32xf32>
    %9 = arith.minimumf %8, %7 : vector<512x32xf32>
    %10 = arith.truncf %9 : vector<512x32xf32> to vector<512x32xbf16>
    %c0_7 = arith.constant 0 : index
    %c0_8 = arith.constant 0 : index
    %11 = vector.load %arg4[%c0_7, %c0_8] : memref<512x32xbf16, #tpu.memory_space<vmem>>, vector<512x32xbf16>
    tpu.vector_store %arg4[%c0_7, %c0_8], %10 {strides = array<i32>} : memref<512x32xbf16, #tpu.memory_space<vmem>>, vector<512x32xbf16>,
    return
  }
  func.func @transform_0(%arg0: i32) -> (i32, i32) {
    %c0_i32 = arith.constant 0 : i32
    %c0_i32_0 = arith.constant 0 : i32
    return %arg0, %c0_i32 : i32, i32
  }
  func.func @transform_1(%arg0: i32) -> (i32, i32) {
    %c0_i32 = arith.constant 0 : i32
    %c0_i32_0 = arith.constant 0 : i32
    %c0_i32_1 = arith.constant 0 : i32
    return %c0_i32, %c0_i32_0 : i32, i32
  }
  func.func @transform_2(%arg0: i32) -> (i32, i32) {
    %c0_i32 = arith.constant 0 : i32
    %c0_i32_0 = arith.constant 0 : i32
    %c0_i32_1 = arith.constant 0 : i32
    return %c0_i32, %c0_i32_0 : i32, i32
  }
  func.func @transform_3(%arg0: i32) -> (i32, i32) {
    %c0_i32 = arith.constant 0 : i32
    %c0_i32_0 = arith.constant 0 : i32
    return %arg0, %c0_i32 : i32, i32
  }
}

</mosaic_0001>

<bundles_post_ra>
// kernel: tpu_custom_call.1
= control target key start
LH: loop header
LB: loop body
LE: loop exit
PB: predicated region body
PF: predicated region fallthrough
CT: control target
= control target key end

     0   :  { %vm358_vm0 = vcmask 1044480   ;;  %vm359_vm1 = vcmask 1045504   ;;  %vm261_vm2 = vcmask 220160   ;;  %v1443_v1 = vmov 65535   ;;  %s1923_s1 = inlined_call_operand.vmem [shape: bf16[27,32], index: 1, kind: input, shape index: {}]   ;;  %s1924_s0 = inlined_call_operand.vmem [shape: bf16[512,27], index: 0, kind: input, shape index: {}]   ;;  %s1925_s2 = inlined_call_operand.vmem [shape: f32[1,32], index: 2, kind: input, shape index: {}]   ;;  %s1926_s3 = inlined_call_operand.vmem [shape: bf16[512,32], index: 3, kind: output, shape index: {}]  }
   0x1   :  { %v1409_v0 = vld [vmem:[%s1923_s1] sm:$0xff]   ;;  %v360_v2 = vsel %vm358_vm0, 4294967295, %v1443_v1  ;;  %v1410_v3 = vld [vmem:[%s1923_s1 + $0x8] sm:$0x3f]   ;;  %v1415_v10 = vld [vmem:[%s1924_s0 + $0x10] sm:$0xff]   ;;  %vm1038_vm3 = vcmask 257024  }
   0x2   :  { %1336 = vmatprep.subr.bf16.mxu0 %v1409_v0  ;;  %1404 = vmatprep.subr.bf16.mxu1 %v1409_v0  ;;  %v361_v4 = vsel %vm359_vm1, %v360_v2, 0  ;;  %v1411_v5 = vld [vmem:[%s1924_s0] sm:$0xff]   ;;  %v1413_v8 = vld [vmem:[%s1924_s0 + $0x8] sm:$0xff]   ;;  %v1416_v11 = vld [vmem:[%s1924_s0 + $0x90] sm:$0xff]  }
   0x3   :  { %1337 = vmatpush3.bf16.msra.mxu0 %v1409_v0  ;;  %1406 = vmatpush3.bf16.msra.mxu1 %v1409_v0  ;;  %v363_v6 = vand.u32 %v1410_v3, %v361_v4  ;;  %v1412_v7 = vld [vmem:[%s1924_s0 + $0x80] sm:$0xff]   ;;  %v1414_v9 = vld [vmem:[%s1924_s0 + $0x88] sm:$0xff]   ;;  %v1417_v12 = vld [vmem:[%s1924_s0 + $0x18] sm:$0xff]  }
   0x4   :  { %1340 = vmatprep.mubr.msk.bf16.mxu0 %vm261_vm2, %v1411_v5  ;;  %1372 = vmatprep.mubr.msk.bf16.mxu1 %vm261_vm2, %v1412_v7  ;;  %v1418_v13 = vld [vmem:[%s1924_s0 + $0x98] sm:$0xff]   ;;  %v1419_v14 = vld [vmem:[%s1924_s0 + $0x20] sm:$0xff]   ;;  %v1421_v16 = vld [vmem:[%s1924_s0 + $0x28] sm:$0xff]  }
   0x5   :  { %1338 = vmatprep.subr.bf16.mxu0 %v363_v6  ;;  %1405 = vmatprep.subr.bf16.mxu1 %v363_v6  ;;  %v1420_v15 = vld [vmem:[%s1924_s0 + $0xa0] sm:$0xff]   ;;  %v1422_v17 = vld [vmem:[%s1924_s0 + $0xa8] sm:$0xff]   ;;  %v1423_v18 = vld [vmem:[%s1924_s0 + $0x30] sm:$0xff]  }
   0x6   :  { %v1424_v19 = vld [vmem:[%s1924_s0 + $0xb0] sm:$0xff]   ;;  %v1425_v20 = vld [vmem:[%s1924_s0 + $0x38] sm:$0xff]   ;;  %v1427_v22 = vld [vmem:[%s1924_s0 + $0x40] sm:$0xff]  }
   0x7   :  { %1339 = vmatpush3.bf16.msra.mxu0 %v363_v6  ;;  %1407 = vmatpush3.bf16.msra.mxu1 %v363_v6  ;;  %v1426_v21 = vld [vmem:[%s1924_s0 + $0xb8] sm:$0xff]   ;;  %v1428_v23 = vld [vmem:[%s1924_s0 + $0xc0] sm:$0xff]   ;;  %v1429_v24 = vld [vmem:[%s1924_s0 + $0x48] sm:$0xff]  }
   0x8   :  { %v1430_v25 = vld [vmem:[%s1924_s0 + $0xc8] sm:$0xff]   ;;  %v1431_v26 = vld [vmem:[%s1924_s0 + $0x50] sm:$0xff]   ;;  %v1433_v28 = vld [vmem:[%s1924_s0 + $0x58] sm:$0xff]  }
   0x9   :  { %v1432_v27 = vld [vmem:[%s1924_s0 + $0xd0] sm:$0xff]   ;;  %v1434_v29 = vld [vmem:[%s1924_s0 + $0xd8] sm:$0xff]   ;;  %v1435_v30 = vld [vmem:[%s1924_s0 + $0x60] sm:$0xff]  }
   0xa   :  { %1341 = vmatmul.mubr.msk.bf16.vlgmr.msra.gmra.mrb[0].mxu0 %vm261_vm2, %v1413_v8  ;;  %1373 = vmatmul.mubr.msk.bf16.vlgmr.msra.gmra.mrb[0].mxu1 %vm261_vm2, %v1414_v9  ;;  %v1436_v31 = vld [vmem:[%s1924_s0 + $0xe0] sm:$0xff]   ;;  %v1437_v32 = vld [vmem:[%s1924_s0 + $0x68] sm:$0xff]   ;;  %v1439_v34 = vld [vmem:[%s1924_s0 + $0x70] sm:$0xff]  }
   0xb   :  { %1344 = vmatprep.mubr.msk.bf16.mxu0 %vm261_vm2, %v1415_v10  ;;  %1376 = vmatprep.mubr.msk.bf16.mxu1 %vm261_vm2, %v1416_v11  ;;  %v1438_v33 = vld [vmem:[%s1924_s0 + $0xe8] sm:$0xff]   ;;  %v1440_v35 = vld [vmem:[%s1924_s0 + $0xf0] sm:$0xff]   ;;  %v1441_v36 = vld [vmem:[%s1924_s0 + $0x78] sm:$0xff]  }
   0xc   :  { %v1442_v37 = vld [vmem:[%s1924_s0 + $0xf8] sm:$0xff]   ;;  %v1601_v38 = vld [vmem:[%s1925_s2] ss:$0 sm:$0xff] }
  0x12   :  { %1345 = vmatmul.mubr.msk.bf16.gmra.mrb[4].mxu0 %vm261_vm2, %v1417_v12  ;;  %1377 = vmatmul.mubr.msk.bf16.gmra.mrb[4].mxu1 %vm261_vm2, %v1418_v13 }
  0x13   :  { %1348 = vmatprep.mubr.msk.bf16.mxu0 %vm261_vm2, %v1419_v14  ;;  %1380 = vmatprep.mubr.msk.bf16.mxu1 %vm261_vm2, %v1420_v15 }
  0x1a   :  { %1349 = vmatmul.mubr.msk.bf16.gmra.mrb[8].mxu0 %vm261_vm2, %v1421_v16  ;;  %1381 = vmatmul.mubr.msk.bf16.gmra.mrb[8].mxu1 %vm261_vm2, %v1422_v17 }
  0x1b   :  { %1352 = vmatprep.mubr.msk.bf16.mxu0 %vm261_vm2, %v1423_v18  ;;  %1384 = vmatprep.mubr.msk.bf16.mxu1 %vm261_vm2, %v1424_v19 }
  0x22   :  { %1353 = vmatmul.mubr.msk.bf16.gmra.mrb[12].mxu0 %vm261_vm2, %v1425_v20  ;;  %1385 = vmatmul.mubr.msk.bf16.gmra.mrb[12].mxu1 %vm261_vm2, %v1426_v21 }
  0x23   :  { %1356 = vmatprep.mubr.msk.bf16.mxu0 %vm261_vm2, %v1427_v22  ;;  %1388 = vmatprep.mubr.msk.bf16.mxu1 %vm261_vm2, %v1428_v23 }
  0x2a   :  { %1357 = vmatmul.mubr.msk.bf16.gmra.mrb[16].mxu0 %vm261_vm2, %v1429_v24  ;;  %1389 = vmatmul.mubr.msk.bf16.gmra.mrb[16].mxu1 %vm261_vm2, %v1430_v25 }
  0x2b   :  { %1360 = vmatprep.mubr.msk.bf16.mxu0 %vm261_vm2, %v1431_v26  ;;  %1392 = vmatprep.mubr.msk.bf16.mxu1 %vm261_vm2, %v1432_v27 }
  0x32   :  { %1361 = vmatmul.mubr.msk.bf16.gmra.mrb[20].mxu0 %vm261_vm2, %v1433_v28  ;;  %1393 = vmatmul.mubr.msk.bf16.gmra.mrb[20].mxu1 %vm261_vm2, %v1434_v29 }
  0x33   :  { %1364 = vmatprep.mubr.msk.bf16.mxu0 %vm261_vm2, %v1435_v30  ;;  %1396 = vmatprep.mubr.msk.bf16.mxu1 %vm261_vm2, %v1436_v31 }
  0x3a   :  { %1365 = vmatmul.mubr.msk.bf16.gmra.mrb[24].mxu0 %vm261_vm2, %v1437_v32  ;;  %1397 = vmatmul.mubr.msk.bf16.gmra.mrb[24].mxu1 %vm261_vm2, %v1438_v33 }
  0x3b   :  { %1368 = vmatprep.mubr.msk.bf16.mxu0 %vm261_vm2, %v1439_v34  ;;  %1400 = vmatprep.mubr.msk.bf16.mxu1 %vm261_vm2, %v1440_v35 }
  0x42   :  { %1369 = vmatmul.mubr.msk.bf16.gmra.mrb[28].mxu0 %vm261_vm2, %v1441_v36  ;;  %1401 = vmatmul.mubr.msk.bf16.gmra.mrb[28].mxu1 %vm261_vm2, %v1442_v37 }
  0xdd   :  { %v1342_v39 = vpop.f32.mrb[0].mxu0  ;;  %v1374_v40 = vpop.f32.mrb[0].mxu1 }
  0xde   :  { %v408_v41 = vadd.f32 %v1342_v39, %v1601_v38  ;;  %v536_v42 = vadd.f32 %v1374_v40, %v1601_v38  ;;  %v399_v43 = vpop.f32.mrb[1].mxu0  ;;  %v527_v44 = vpop.f32.mrb[1].mxu1 }
  0xdf   :  { %v400_v45 = vadd.f32 %v1601_v38, %v399_v43  ;;  %v528_v46 = vadd.f32 %v1601_v38, %v527_v44  ;;  %v1343_v47 = vpop.f32.mrb[2].mxu0  ;;  %v1375_v48 = vpop.f32.mrb[2].mxu1 }
  0xe0   :  { %v656_v49 = vmax.f32 %v408_v41, 0.0  ;;  %v688_v50 = vmax.f32 %v536_v42, 0.0  ;;  %v411_v51 = vadd.f32 %v1343_v47, %v1601_v38  ;;  %v539_v52 = vadd.f32 %v1375_v48, %v1601_v38  ;;  %v402_v53 = vpop.f32.mrb[3].mxu0  ;;  %v530_v54 = vpop.f32.mrb[3].mxu1 }
  0xe1   :  { %v654_v55 = vmax.f32 %v400_v45, 0.0  ;;  %v686_v56 = vmax.f32 %v528_v46, 0.0  ;;  %v403_v57 = vadd.f32 %v1601_v38, %v402_v53  ;;  %v531_v58 = vadd.f32 %v1601_v38, %v530_v54 }
  0xe2   :  { %v720_v59 = vmin.f32 %v656_v49, 6.0  ;;  %v752_v60 = vmin.f32 %v688_v50, 6.0  ;;  %v657_v61 = vmax.f32 %v411_v51, 0.0  ;;  %v689_v62 = vmax.f32 %v539_v52, 0.0 }
  0xe3   :  { %v718_v63 = vmin.f32 %v654_v55, 6.0  ;;  %v750_v0 = vmin.f32 %v686_v56, 6.0  ;;  %v655_v1 = vmax.f32 %v403_v57, 0.0  ;;  %v687_v2 = vmax.f32 %v531_v58, 0.0 }
  0xe4   :  { %v1240_v3 = vpack.c.bf16 %v720_v59, %v720_v59  ;;  %v1272_v4 = vpack.c.bf16 %v752_v60, %v752_v60  ;;  %v721_v5 = vmin.f32 %v657_v61, 6.0  ;;  %v753_v6 = vmin.f32 %v689_v62, 6.0 }
  0xe5   :  { %v1238_v7 = vpack.c.bf16 %v718_v63, %v718_v63  ;;  %v1270_v8 = vpack.c.bf16 %v750_v0, %v750_v0  ;;  %v719_v9 = vmin.f32 %v655_v1, 6.0  ;;  %v751_v10 = vmin.f32 %v687_v2, 6.0  ;;  %v1346_v11 = vpop.f32.mrb[4].mxu0  ;;  %v1378_v12 = vpop.f32.mrb[4].mxu1 }
  0xe6   :  { %1041 = vst.msk [vmem:[%s1926_s3 + $0x8] sm:$0xf] %vm1038_vm3, %v1240_v3  ;;  %1073 = vst.msk [vmem:[%s1926_s3 + $0x88] sm:$0xf] %vm1038_vm3, %v1272_v4  ;;  %v1241_v13 = vpack.c.bf16 %v721_v5, %v721_v5  ;;  %v1273_v14 = vpack.c.bf16 %v753_v6, %v753_v6  ;;  %v424_v15 = vadd.f32 %v1346_v11, %v1601_v38  ;;  %v415_v17 = vpop.f32.mrb[5].mxu0  ;;  %v543_v18 = vpop.f32.mrb[5].mxu1 }
  0xe7   :  { %v552_v16 = vadd.f32 %v1378_v12, %v1601_v38  ;;  %1039 = vst.msk [vmem:[%s1926_s3] sm:$0xf] %vm1038_vm3, %v1238_v7  ;;  %1071 = vst.msk [vmem:[%s1926_s3 + $0x80] sm:$0xf] %vm1038_vm3, %v1270_v8  ;;  %v1239_v19 = vpack.c.bf16 %v719_v9, %v719_v9  ;;  %v1271_v20 = vpack.c.bf16 %v751_v10, %v751_v10  ;;  %v1347_v23 = vpop.f32.mrb[6].mxu0  ;;  %v1379_v24 = vpop.f32.mrb[6].mxu1 }
  0xe8   :  { %v416_v21 = vadd.f32 %v1601_v38, %v415_v17  ;;  %v544_v22 = vadd.f32 %v1601_v38, %v543_v18  ;;  %1042 = vst.msk [vmem:[%s1926_s3 + $0xc] sm:$0xf] %vm1038_vm3, %v1241_v13  ;;  %1074 = vst.msk [vmem:[%s1926_s3 + $0x8c] sm:$0xf] %vm1038_vm3, %v1273_v14  ;;  %v660_v25 = vmax.f32 %v424_v15, 0.0  ;;  %v427_v27 = vadd.f32 %v1347_v23, %v1601_v38  ;;  %v418_v29 = vpop.f32.mrb[7].mxu0 }
  0xe9   :  { %v692_v26 = vmax.f32 %v552_v16, 0.0  ;;  %v555_v28 = vadd.f32 %v1379_v24, %v1601_v38  ;;  %v546_v30 = vpop.f32.mrb[7].mxu1  ;;  %1040 = vst.msk [vmem:[%s1926_s3 + $0x4] sm:$0xf] %vm1038_vm3, %v1239_v19  ;;  %1072 = vst.msk [vmem:[%s1926_s3 + $0x84] sm:$0xf] %vm1038_vm3, %v1271_v20  ;;  %v419_v33 = vadd.f32 %v1601_v38, %v418_v29 }
  0xea   :  { %v658_v31 = vmax.f32 %v416_v21, 0.0  ;;  %v690_v32 = vmax.f32 %v544_v22, 0.0  ;;  %v547_v34 = vadd.f32 %v1601_v38, %v546_v30  ;;  %v724_v35 = vmin.f32 %v660_v25, 6.0 }
  0xeb   :  { %v756_v36 = vmin.f32 %v692_v26, 6.0  ;;  %v661_v37 = vmax.f32 %v427_v27, 0.0  ;;  %v693_v39 = vmax.f32 %v555_v28, 0.0  ;;  %v659_v42 = vmax.f32 %v419_v33, 0.0 }
  0xec   :  { %v722_v40 = vmin.f32 %v658_v31, 6.0  ;;  %v754_v41 = vmin.f32 %v690_v32, 6.0  ;;  %v691_v43 = vmax.f32 %v547_v34, 0.0  ;;  %v1244_v44 = vpack.c.bf16 %v724_v35, %v724_v35 }
  0xed   :  { %v1276_v45 = vpack.c.bf16 %v756_v36, %v756_v36  ;;  %v725_v46 = vmin.f32 %v661_v37, 6.0  ;;  %v757_v47 = vmin.f32 %v693_v39, 6.0  ;;  %v723_v50 = vmin.f32 %v659_v42, 6.0  ;;  %v1350_v52 = vpop.f32.mrb[8].mxu0  ;;  %v1382_v53 = vpop.f32.mrb[8].mxu1 }
  0xee   :  { %v1242_v48 = vpack.c.bf16 %v722_v40, %v722_v40  ;;  %v1274_v49 = vpack.c.bf16 %v754_v41, %v754_v41  ;;  %v755_v51 = vmin.f32 %v691_v43, 6.0  ;;  %1045 = vst.msk [vmem:[%s1926_s3 + $0x18] sm:$0xf] %vm1038_vm3, %v1244_v44  ;;  %v440_v56 = vadd.f32 %v1350_v52, %v1601_v38  ;;  %v431_v58 = vpop.f32.mrb[9].mxu0  ;;  %v559_v59 = vpop.f32.mrb[9].mxu1 }
  0xef   :  { %1077 = vst.msk [vmem:[%s1926_s3 + $0x98] sm:$0xf] %vm1038_vm3, %v1276_v45  ;;  %v1245_v54 = vpack.c.bf16 %v725_v46, %v725_v46  ;;  %v1277_v55 = vpack.c.bf16 %v757_v47, %v757_v47  ;;  %v568_v57 = vadd.f32 %v1382_v53, %v1601_v38  ;;  %v1243_v60 = vpack.c.bf16 %v723_v50, %v723_v50  ;;  %v1351_v0 = vpop.f32.mrb[10].mxu0  ;;  %v1383_v1 = vpop.f32.mrb[10].mxu1 }
  0xf0   :  { %1043 = vst.msk [vmem:[%s1926_s3 + $0x10] sm:$0xf] %vm1038_vm3, %v1242_v48  ;;  %1075 = vst.msk [vmem:[%s1926_s3 + $0x90] sm:$0xf] %vm1038_vm3, %v1274_v49  ;;  %v1275_v61 = vpack.c.bf16 %v755_v51, %v755_v51  ;;  %v432_v62 = vadd.f32 %v1601_v38, %v431_v58  ;;  %v560_v63 = vadd.f32 %v1601_v38, %v559_v59  ;;  %v664_v2 = vmax.f32 %v440_v56, 0.0  ;;  %v434_v6 = vpop.f32.mrb[11].mxu0 }
  0xf1   :  { %1046 = vst.msk [vmem:[%s1926_s3 + $0x1c] sm:$0xf] %vm1038_vm3, %v1245_v54  ;;  %1078 = vst.msk [vmem:[%s1926_s3 + $0x9c] sm:$0xf] %vm1038_vm3, %v1277_v55  ;;  %v696_v3 = vmax.f32 %v568_v57, 0.0  ;;  %v443_v4 = vadd.f32 %v1351_v0, %v1601_v38  ;;  %v571_v5 = vadd.f32 %v1383_v1, %v1601_v38  ;;  %v562_v7 = vpop.f32.mrb[11].mxu1  ;;  %v435_v10 = vadd.f32 %v1601_v38, %v434_v6 }
  0xf2   :  { %1044 = vst.msk [vmem:[%s1926_s3 + $0x14] sm:$0xf] %vm1038_vm3, %v1243_v60  ;;  %1076 = vst.msk [vmem:[%s1926_s3 + $0x94] sm:$0xf] %vm1038_vm3, %v1275_v61  ;;  %v662_v8 = vmax.f32 %v432_v62, 0.0  ;;  %v694_v9 = vmax.f32 %v560_v63, 0.0  ;;  %v563_v11 = vadd.f32 %v1601_v38, %v562_v7 }
  0xf3   :  { %v728_v12 = vmin.f32 %v664_v2, 6.0  ;;  %v760_v13 = vmin.f32 %v696_v3, 6.0  ;;  %v665_v14 = vmax.f32 %v443_v4, 0.0  ;;  %v697_v15 = vmax.f32 %v571_v5, 0.0 }
  0xf4   :  { %v726_v16 = vmin.f32 %v662_v8, 6.0  ;;  %v758_v17 = vmin.f32 %v694_v9, 6.0  ;;  %v663_v18 = vmax.f32 %v435_v10, 0.0  ;;  %v695_v19 = vmax.f32 %v563_v11, 0.0 }
  0xf5   :  { %v1248_v20 = vpack.c.bf16 %v728_v12, %v728_v12  ;;  %v1280_v21 = vpack.c.bf16 %v760_v13, %v760_v13  ;;  %v729_v22 = vmin.f32 %v665_v14, 6.0  ;;  %v761_v23 = vmin.f32 %v697_v15, 6.0  ;;  %v1354_v28 = vpop.f32.mrb[12].mxu0  ;;  %v1386_v29 = vpop.f32.mrb[12].mxu1 }
  0xf6   :  { %v1246_v24 = vpack.c.bf16 %v726_v16, %v726_v16  ;;  %v1278_v25 = vpack.c.bf16 %v758_v17, %v758_v17  ;;  %v727_v26 = vmin.f32 %v663_v18, 6.0  ;;  %v759_v27 = vmin.f32 %v695_v19, 6.0  ;;  %v447_v34 = vpop.f32.mrb[13].mxu0  ;;  %v575_v35 = vpop.f32.mrb[13].mxu1 }
  0xf7   :  { %1049 = vst.msk [vmem:[%s1926_s3 + $0x28] sm:$0xf] %vm1038_vm3, %v1248_v20  ;;  %1081 = vst.msk [vmem:[%s1926_s3 + $0xa8] sm:$0xf] %vm1038_vm3, %v1280_v21  ;;  %v1249_v30 = vpack.c.bf16 %v729_v22, %v729_v22  ;;  %v1281_v31 = vpack.c.bf16 %v761_v23, %v761_v23  ;;  %v456_v32 = vadd.f32 %v1354_v28, %v1601_v38  ;;  %v1355_v41 = vpop.f32.mrb[14].mxu0  ;;  %v1387_v42 = vpop.f32.mrb[14].mxu1 }
  0xf8   :  { %v584_v33 = vadd.f32 %v1386_v29, %v1601_v38  ;;  %1047 = vst.msk [vmem:[%s1926_s3 + $0x20] sm:$0xf] %vm1038_vm3, %v1246_v24  ;;  %1079 = vst.msk [vmem:[%s1926_s3 + $0xa0] sm:$0xf] %vm1038_vm3, %v1278_v25  ;;  %v1247_v36 = vpack.c.bf16 %v727_v26, %v727_v26  ;;  %v1279_v37 = vpack.c.bf16 %v759_v27, %v759_v27  ;;  %v450_v47 = vpop.f32.mrb[15].mxu0  ;;  %v578_v48 = vpop.f32.mrb[15].mxu1 }
  0xf9   :  { %v448_v39 = vadd.f32 %v1601_v38, %v447_v34  ;;  %v576_v40 = vadd.f32 %v1601_v38, %v575_v35  ;;  %1050 = vst.msk [vmem:[%s1926_s3 + $0x2c] sm:$0xf] %vm1038_vm3, %v1249_v30  ;;  %1082 = vst.msk [vmem:[%s1926_s3 + $0xac] sm:$0xf] %vm1038_vm3, %v1281_v31  ;;  %v668_v43 = vmax.f32 %v456_v32, 0.0  ;;  %v459_v45 = vadd.f32 %v1355_v41, %v1601_v38 }
  0xfa   :  { %v700_v44 = vmax.f32 %v584_v33, 0.0  ;;  %v587_v46 = vadd.f32 %v1387_v42, %v1601_v38  ;;  %1048 = vst.msk [vmem:[%s1926_s3 + $0x24] sm:$0xf] %vm1038_vm3, %v1247_v36  ;;  %1080 = vst.msk [vmem:[%s1926_s3 + $0xa4] sm:$0xf] %vm1038_vm3, %v1279_v37  ;;  %v451_v51 = vadd.f32 %v1601_v38, %v450_v47  ;;  %v579_v52 = vadd.f32 %v1601_v38, %v578_v48 }
  0xfb   :  { %v666_v49 = vmax.f32 %v448_v39, 0.0  ;;  %v698_v50 = vmax.f32 %v576_v40, 0.0  ;;  %v732_v53 = vmin.f32 %v668_v43, 6.0  ;;  %v669_v55 = vmax.f32 %v459_v45, 0.0 }
  0xfc   :  { %v764_v54 = vmin.f32 %v700_v44, 6.0  ;;  %v701_v56 = vmax.f32 %v587_v46, 0.0  ;;  %v667_v59 = vmax.f32 %v451_v51, 0.0  ;;  %v699_v60 = vmax.f32 %v579_v52, 0.0 }
  0xfd   :  { %v730_v57 = vmin.f32 %v666_v49, 6.0  ;;  %v762_v58 = vmin.f32 %v698_v50, 6.0  ;;  %v1252_v61 = vpack.c.bf16 %v732_v53, %v732_v53  ;;  %v733_v63 = vmin.f32 %v669_v55, 6.0  ;;  %v1358_v5 = vpop.f32.mrb[16].mxu0  ;;  %v1390_v6 = vpop.f32.mrb[16].mxu1 }
  0xfe   :  { %v1284_v62 = vpack.c.bf16 %v764_v54, %v764_v54  ;;  %v765_v0 = vmin.f32 %v701_v56, 6.0  ;;  %v731_v3 = vmin.f32 %v667_v59, 6.0  ;;  %v763_v4 = vmin.f32 %v699_v60, 6.0  ;;  %v463_v11 = vpop.f32.mrb[17].mxu0  ;;  %v591_v12 = vpop.f32.mrb[17].mxu1 }
  0xff   :  { %v1250_v1 = vpack.c.bf16 %v730_v57, %v730_v57  ;;  %v1282_v2 = vpack.c.bf16 %v762_v58, %v762_v58  ;;  %1053 = vst.msk [vmem:[%s1926_s3 + $0x38] sm:$0xf] %vm1038_vm3, %v1252_v61  ;;  %v1253_v7 = vpack.c.bf16 %v733_v63, %v733_v63  ;;  %v472_v9 = vadd.f32 %v1358_v5, %v1601_v38  ;;  %v1359_v17 = vpop.f32.mrb[18].mxu0  ;;  %v1391_v18 = vpop.f32.mrb[18].mxu1 }
 0x100   :  { %1085 = vst.msk [vmem:[%s1926_s3 + $0xb8] sm:$0xf] %vm1038_vm3, %v1284_v62  ;;  %v1285_v8 = vpack.c.bf16 %v765_v0, %v765_v0  ;;  %v600_v10 = vadd.f32 %v1390_v6, %v1601_v38  ;;  %v1251_v13 = vpack.c.bf16 %v731_v3, %v731_v3  ;;  %v1283_v14 = vpack.c.bf16 %v763_v4, %v763_v4  ;;  %v466_v23 = vpop.f32.mrb[19].mxu0  ;;  %v594_v24 = vpop.f32.mrb[19].mxu1 }
 0x101   :  { %1051 = vst.msk [vmem:[%s1926_s3 + $0x30] sm:$0xf] %vm1038_vm3, %v1250_v1  ;;  %1083 = vst.msk [vmem:[%s1926_s3 + $0xb0] sm:$0xf] %vm1038_vm3, %v1282_v2  ;;  %v464_v15 = vadd.f32 %v1601_v38, %v463_v11  ;;  %v592_v16 = vadd.f32 %v1601_v38, %v591_v12  ;;  %v672_v19 = vmax.f32 %v472_v9, 0.0  ;;  %v475_v21 = vadd.f32 %v1359_v17, %v1601_v38 }
 0x102   :  { %1054 = vst.msk [vmem:[%s1926_s3 + $0x3c] sm:$0xf] %vm1038_vm3, %v1253_v7  ;;  %1086 = vst.msk [vmem:[%s1926_s3 + $0xbc] sm:$0xf] %vm1038_vm3, %v1285_v8  ;;  %v704_v20 = vmax.f32 %v600_v10, 0.0  ;;  %v603_v22 = vadd.f32 %v1391_v18, %v1601_v38  ;;  %v467_v27 = vadd.f32 %v1601_v38, %v466_v23  ;;  %v595_v28 = vadd.f32 %v1601_v38, %v594_v24 }
 0x103   :  { %1052 = vst.msk [vmem:[%s1926_s3 + $0x34] sm:$0xf] %vm1038_vm3, %v1251_v13  ;;  %1084 = vst.msk [vmem:[%s1926_s3 + $0xb4] sm:$0xf] %vm1038_vm3, %v1283_v14  ;;  %v670_v25 = vmax.f32 %v464_v15, 0.0  ;;  %v702_v26 = vmax.f32 %v592_v16, 0.0 }
 0x104   :  { %v736_v29 = vmin.f32 %v672_v19, 6.0  ;;  %v768_v30 = vmin.f32 %v704_v20, 6.0  ;;  %v673_v31 = vmax.f32 %v475_v21, 0.0  ;;  %v705_v32 = vmax.f32 %v603_v22, 0.0 }
 0x105   :  { %v734_v33 = vmin.f32 %v670_v25, 6.0  ;;  %v766_v34 = vmin.f32 %v702_v26, 6.0  ;;  %v671_v35 = vmax.f32 %v467_v27, 0.0  ;;  %v703_v36 = vmax.f32 %v595_v28, 0.0  ;;  %v1362_v46 = vpop.f32.mrb[20].mxu0  ;;  %v1394_v47 = vpop.f32.mrb[20].mxu1 }
 0x106   :  { %v1256_v37 = vpack.c.bf16 %v736_v29, %v736_v29  ;;  %v1288_v39 = vpack.c.bf16 %v768_v30, %v768_v30  ;;  %v737_v40 = vmin.f32 %v673_v31, 6.0  ;;  %v769_v41 = vmin.f32 %v705_v32, 6.0  ;;  %v479_v52 = vpop.f32.mrb[21].mxu0  ;;  %v607_v53 = vpop.f32.mrb[21].mxu1 }
 0x107   :  { %v1254_v42 = vpack.c.bf16 %v734_v33, %v734_v33  ;;  %v1286_v43 = vpack.c.bf16 %v766_v34, %v766_v34  ;;  %v735_v44 = vmin.f32 %v671_v35, 6.0  ;;  %v767_v45 = vmin.f32 %v703_v36, 6.0  ;;  %v1363_v58 = vpop.f32.mrb[22].mxu0  ;;  %v1395_v59 = vpop.f32.mrb[22].mxu1 }
 0x108   :  { %1057 = vst.msk [vmem:[%s1926_s3 + $0x48] sm:$0xf] %vm1038_vm3, %v1256_v37  ;;  %1089 = vst.msk [vmem:[%s1926_s3 + $0xc8] sm:$0xf] %vm1038_vm3, %v1288_v39  ;;  %v1257_v48 = vpack.c.bf16 %v737_v40, %v737_v40  ;;  %v1289_v49 = vpack.c.bf16 %v769_v41, %v769_v41  ;;  %v488_v50 = vadd.f32 %v1362_v46, %v1601_v38  ;;  %v482_v0 = vpop.f32.mrb[23].mxu0  ;;  %v610_v1 = vpop.f32.mrb[23].mxu1 }
 0x109   :  { %v616_v51 = vadd.f32 %v1394_v47, %v1601_v38  ;;  %1055 = vst.msk [vmem:[%s1926_s3 + $0x40] sm:$0xf] %vm1038_vm3, %v1254_v42  ;;  %1087 = vst.msk [vmem:[%s1926_s3 + $0xc0] sm:$0xf] %vm1038_vm3, %v1286_v43  ;;  %v1255_v54 = vpack.c.bf16 %v735_v44, %v735_v44  ;;  %v1287_v55 = vpack.c.bf16 %v767_v45, %v767_v45 }
 0x10a   :  { %v480_v56 = vadd.f32 %v1601_v38, %v479_v52  ;;  %v608_v57 = vadd.f32 %v1601_v38, %v607_v53  ;;  %1058 = vst.msk [vmem:[%s1926_s3 + $0x4c] sm:$0xf] %vm1038_vm3, %v1257_v48  ;;  %1090 = vst.msk [vmem:[%s1926_s3 + $0xcc] sm:$0xf] %vm1038_vm3, %v1289_v49  ;;  %v676_v60 = vmax.f32 %v488_v50, 0.0  ;;  %v491_v62 = vadd.f32 %v1363_v58, %v1601_v38 }
 0x10b   :  { %v708_v61 = vmax.f32 %v616_v51, 0.0  ;;  %v619_v63 = vadd.f32 %v1395_v59, %v1601_v38  ;;  %1056 = vst.msk [vmem:[%s1926_s3 + $0x44] sm:$0xf] %vm1038_vm3, %v1255_v54  ;;  %1088 = vst.msk [vmem:[%s1926_s3 + $0xc4] sm:$0xf] %vm1038_vm3, %v1287_v55  ;;  %v483_v4 = vadd.f32 %v1601_v38, %v482_v0  ;;  %v611_v5 = vadd.f32 %v1601_v38, %v610_v1 }
 0x10c   :  { %v674_v2 = vmax.f32 %v480_v56, 0.0  ;;  %v706_v3 = vmax.f32 %v608_v57, 0.0  ;;  %v740_v6 = vmin.f32 %v676_v60, 6.0  ;;  %v677_v8 = vmax.f32 %v491_v62, 0.0 }
 0x10d   :  { %v772_v7 = vmin.f32 %v708_v61, 6.0  ;;  %v709_v9 = vmax.f32 %v619_v63, 0.0  ;;  %v675_v12 = vmax.f32 %v483_v4, 0.0  ;;  %v707_v13 = vmax.f32 %v611_v5, 0.0  ;;  %v1366_v22 = vpop.f32.mrb[24].mxu0  ;;  %v1398_v23 = vpop.f32.mrb[24].mxu1 }
 0x10e   :  { %v738_v10 = vmin.f32 %v674_v2, 6.0  ;;  %v770_v11 = vmin.f32 %v706_v3, 6.0  ;;  %v1260_v14 = vpack.c.bf16 %v740_v6, %v740_v6  ;;  %v741_v16 = vmin.f32 %v677_v8, 6.0  ;;  %v495_v28 = vpop.f32.mrb[25].mxu0  ;;  %v623_v29 = vpop.f32.mrb[25].mxu1 }
 0x10f   :  { %v1292_v15 = vpack.c.bf16 %v772_v7, %v772_v7  ;;  %v773_v17 = vmin.f32 %v709_v9, 6.0  ;;  %v739_v20 = vmin.f32 %v675_v12, 6.0  ;;  %v771_v21 = vmin.f32 %v707_v13, 6.0  ;;  %v1367_v34 = vpop.f32.mrb[26].mxu0  ;;  %v1399_v35 = vpop.f32.mrb[26].mxu1 }
 0x110   :  { %v1258_v18 = vpack.c.bf16 %v738_v10, %v738_v10  ;;  %v1290_v19 = vpack.c.bf16 %v770_v11, %v770_v11  ;;  %1061 = vst.msk [vmem:[%s1926_s3 + $0x58] sm:$0xf] %vm1038_vm3, %v1260_v14  ;;  %v1261_v24 = vpack.c.bf16 %v741_v16, %v741_v16  ;;  %v504_v26 = vadd.f32 %v1366_v22, %v1601_v38  ;;  %v498_v41 = vpop.f32.mrb[27].mxu0  ;;  %v626_v42 = vpop.f32.mrb[27].mxu1 }
 0x111   :  { %1093 = vst.msk [vmem:[%s1926_s3 + $0xd8] sm:$0xf] %vm1038_vm3, %v1292_v15  ;;  %v1293_v25 = vpack.c.bf16 %v773_v17, %v773_v17  ;;  %v632_v27 = vadd.f32 %v1398_v23, %v1601_v38  ;;  %v1259_v30 = vpack.c.bf16 %v739_v20, %v739_v20  ;;  %v1291_v31 = vpack.c.bf16 %v771_v21, %v771_v21 }
 0x112   :  { %1059 = vst.msk [vmem:[%s1926_s3 + $0x50] sm:$0xf] %vm1038_vm3, %v1258_v18  ;;  %1091 = vst.msk [vmem:[%s1926_s3 + $0xd0] sm:$0xf] %vm1038_vm3, %v1290_v19  ;;  %v496_v32 = vadd.f32 %v1601_v38, %v495_v28  ;;  %v624_v33 = vadd.f32 %v1601_v38, %v623_v29  ;;  %v680_v36 = vmax.f32 %v504_v26, 0.0  ;;  %v507_v39 = vadd.f32 %v1367_v34, %v1601_v38 }
 0x113   :  { %1062 = vst.msk [vmem:[%s1926_s3 + $0x5c] sm:$0xf] %vm1038_vm3, %v1261_v24  ;;  %1094 = vst.msk [vmem:[%s1926_s3 + $0xdc] sm:$0xf] %vm1038_vm3, %v1293_v25  ;;  %v712_v37 = vmax.f32 %v632_v27, 0.0  ;;  %v635_v40 = vadd.f32 %v1399_v35, %v1601_v38  ;;  %v499_v45 = vadd.f32 %v1601_v38, %v498_v41  ;;  %v627_v46 = vadd.f32 %v1601_v38, %v626_v42 }
 0x114   :  { %1060 = vst.msk [vmem:[%s1926_s3 + $0x54] sm:$0xf] %vm1038_vm3, %v1259_v30  ;;  %1092 = vst.msk [vmem:[%s1926_s3 + $0xd4] sm:$0xf] %vm1038_vm3, %v1291_v31  ;;  %v678_v43 = vmax.f32 %v496_v32, 0.0  ;;  %v710_v44 = vmax.f32 %v624_v33, 0.0 }
 0x115   :  { %v744_v47 = vmin.f32 %v680_v36, 6.0  ;;  %v776_v48 = vmin.f32 %v712_v37, 6.0  ;;  %v681_v49 = vmax.f32 %v507_v39, 0.0  ;;  %v713_v50 = vmax.f32 %v635_v40, 0.0  ;;  %v1370_v63 = vpop.f32.mrb[28].mxu0  ;;  %v1402_v0 = vpop.f32.mrb[28].mxu1 }
 0x116   :  { %v742_v51 = vmin.f32 %v678_v43, 6.0  ;;  %v774_v52 = vmin.f32 %v710_v44, 6.0  ;;  %v679_v53 = vmax.f32 %v499_v45, 0.0  ;;  %v711_v54 = vmax.f32 %v627_v46, 0.0  ;;  %v511_v5 = vpop.f32.mrb[29].mxu0  ;;  %v639_v6 = vpop.f32.mrb[29].mxu1 }
 0x117   :  { %v1264_v55 = vpack.c.bf16 %v744_v47, %v744_v47  ;;  %v1296_v56 = vpack.c.bf16 %v776_v48, %v776_v48  ;;  %v745_v57 = vmin.f32 %v681_v49, 6.0  ;;  %v777_v58 = vmin.f32 %v713_v50, 6.0  ;;  %v1371_v11 = vpop.f32.mrb[30].mxu0  ;;  %v1403_v12 = vpop.f32.mrb[30].mxu1 }
 0x118   :  { %v1262_v59 = vpack.c.bf16 %v742_v51, %v742_v51  ;;  %v1294_v60 = vpack.c.bf16 %v774_v52, %v774_v52  ;;  %v743_v61 = vmin.f32 %v679_v53, 6.0  ;;  %v775_v62 = vmin.f32 %v711_v54, 6.0  ;;  %v514_v17 = vpop.f32.mrb[31].mxu0  ;;  %v642_v18 = vpop.f32.mrb[31].mxu1 }
 0x119   :  { %1065 = vst.msk [vmem:[%s1926_s3 + $0x68] sm:$0xf] %vm1038_vm3, %v1264_v55  ;;  %1097 = vst.msk [vmem:[%s1926_s3 + $0xe8] sm:$0xf] %vm1038_vm3, %v1296_v56  ;;  %v1265_v1 = vpack.c.bf16 %v745_v57, %v745_v57  ;;  %v1297_v2 = vpack.c.bf16 %v777_v58, %v777_v58  ;;  %v520_v3 = vadd.f32 %v1370_v63, %v1601_v38 }
 0x11a   :  { %v648_v4 = vadd.f32 %v1402_v0, %v1601_v38  ;;  %1063 = vst.msk [vmem:[%s1926_s3 + $0x60] sm:$0xf] %vm1038_vm3, %v1262_v59  ;;  %1095 = vst.msk [vmem:[%s1926_s3 + $0xe0] sm:$0xf] %vm1038_vm3, %v1294_v60  ;;  %v1263_v7 = vpack.c.bf16 %v743_v61, %v743_v61  ;;  %v1295_v8 = vpack.c.bf16 %v775_v62, %v775_v62 }
 0x11b   :  { %v512_v9 = vadd.f32 %v1601_v38, %v511_v5  ;;  %v640_v10 = vadd.f32 %v1601_v38, %v639_v6  ;;  %1066 = vst.msk [vmem:[%s1926_s3 + $0x6c] sm:$0xf] %vm1038_vm3, %v1265_v1  ;;  %1098 = vst.msk [vmem:[%s1926_s3 + $0xec] sm:$0xf] %vm1038_vm3, %v1297_v2  ;;  %v684_v13 = vmax.f32 %v520_v3, 0.0  ;;  %v523_v15 = vadd.f32 %v1371_v11, %v1601_v38 }
 0x11c   :  { %v716_v14 = vmax.f32 %v648_v4, 0.0  ;;  %v651_v16 = vadd.f32 %v1403_v12, %v1601_v38  ;;  %1064 = vst.msk [vmem:[%s1926_s3 + $0x64] sm:$0xf] %vm1038_vm3, %v1263_v7  ;;  %1096 = vst.msk [vmem:[%s1926_s3 + $0xe4] sm:$0xf] %vm1038_vm3, %v1295_v8  ;;  %v515_v21 = vadd.f32 %v1601_v38, %v514_v17  ;;  %v643_v22 = vadd.f32 %v1601_v38, %v642_v18 }
 0x11d   :  { %v682_v19 = vmax.f32 %v512_v9, 0.0  ;;  %v714_v20 = vmax.f32 %v640_v10, 0.0  ;;  %v748_v23 = vmin.f32 %v684_v13, 6.0  ;;  %v685_v25 = vmax.f32 %v523_v15, 0.0 }
 0x11e   :  { %v780_v24 = vmin.f32 %v716_v14, 6.0  ;;  %v717_v26 = vmax.f32 %v651_v16, 0.0  ;;  %v683_v29 = vmax.f32 %v515_v21, 0.0  ;;  %v715_v30 = vmax.f32 %v643_v22, 0.0 }
 0x11f   :  { %v746_v27 = vmin.f32 %v682_v19, 6.0  ;;  %v778_v28 = vmin.f32 %v714_v20, 6.0  ;;  %v1268_v31 = vpack.c.bf16 %v748_v23, %v748_v23  ;;  %v749_v33 = vmin.f32 %v685_v25, 6.0 }
 0x120   :  { %v1300_v32 = vpack.c.bf16 %v780_v24, %v780_v24  ;;  %v781_v34 = vmin.f32 %v717_v26, 6.0  ;;  %v747_v37 = vmin.f32 %v683_v29, 6.0  ;;  %v779_v39 = vmin.f32 %v715_v30, 6.0 }
 0x121   :  { %v1266_v35 = vpack.c.bf16 %v746_v27, %v746_v27  ;;  %v1298_v36 = vpack.c.bf16 %v778_v28, %v778_v28  ;;  %1069 = vst.msk [vmem:[%s1926_s3 + $0x78] sm:$0xf] %vm1038_vm3, %v1268_v31  ;;  %v1269_v38 = vpack.c.bf16 %v749_v33, %v749_v33 }
 0x122   :  { %1101 = vst.msk [vmem:[%s1926_s3 + $0xf8] sm:$0xf] %vm1038_vm3, %v1300_v32  ;;  %v1301_v40 = vpack.c.bf16 %v781_v34, %v781_v34  ;;  %v1267_v41 = vpack.c.bf16 %v747_v37, %v747_v37  ;;  %v1299_v42 = vpack.c.bf16 %v779_v39, %v779_v39 }
 0x123   :  { %1067 = vst.msk [vmem:[%s1926_s3 + $0x70] sm:$0xf] %vm1038_vm3, %v1266_v35  ;;  %1099 = vst.msk [vmem:[%s1926_s3 + $0xf0] sm:$0xf] %vm1038_vm3, %v1298_v36 }
 0x124   :  { %1070 = vst.msk [vmem:[%s1926_s3 + $0x7c] sm:$0xf] %vm1038_vm3, %v1269_v38  ;;  %1102 = vst.msk [vmem:[%s1926_s3 + $0xfc] sm:$0xf] %vm1038_vm3, %v1301_v40 }
 0x125   :  { %1068 = vst.msk [vmem:[%s1926_s3 + $0x74] sm:$0xf] %vm1038_vm3, %v1267_v41  ;;  %1100 = vst.msk [vmem:[%s1926_s3 + $0xf4] sm:$0xf] %vm1038_vm3, %v1299_v42 }

</bundles_post_ra>
